<compile_context>
chip_gen: v6e
topology: v6e:2x2x1
jax: 0.10.0
libtpu: 0.0.40
codegen_flags: <defaults>
</compile_context>

<pallas_src>
import jax
import jax.numpy as jnp
from jax.experimental import pallas as pl
from jax.experimental.pallas import tpu as pltpu


OUT_ROWS = 8           # packed output rows: [p_pre, sigma_pre, 3 regime logits, 3 pad]
TILE_B_DEFAULT = 2048  # batch (lane-axis) tile; big tiles amortize per-step overhead


def _round_up(v, m):
    return (v + m - 1) // m * m


def _relu(x):
    return jnp.maximum(x, 0.0)


def _softplus(x):
    # matches torch.nn.Softplus(beta=1, threshold=20)
    return jnp.where(x > 20.0, x, jnp.log1p(jnp.exp(jnp.minimum(x, 20.0))))


def prediction_kernel(xT_ref,
                      w1T_ref, b1T_ref,      # feature extractor   (64, in) bf16 / (64, 1) f32
                      whT_ref, bhT_ref,      # packed 64->{32,32,32} (96, 64) bf16 / (96, 1)
                      wmT_ref, bmT_ref,      # packed 32->1/32->1/32->16 (18, 96) bf16 / (18,1)
                      wfT_ref, bfT_ref,      # packed pass-through + 16->3 (8, 18) bf16 / (8,1)
                      outT_ref):
    # Whole net computed transposed: batch on lanes, features on sublanes.
    # All matmuls are standard-orientation W^T @ act^T (no in-kernel transposes).
    xT = xT_ref[...].astype(jnp.bfloat16)                               # (in_dim, tb)

    # Stage 1: shared feature extractor: Linear(in_dim, 64) + ReLU.
    featT = _relu(jnp.dot(w1T_ref[...], xT,
                          preferred_element_type=jnp.float32) + b1T_ref[...])

    # Stage 2: fused head-input matmul.  Rows 0:32 = pred hidden, 32:64 = sigma
    # hidden, 64:96 = regime hidden-1 (all ReLU'd).
    hT = _relu(jnp.dot(whT_ref[...], featT.astype(jnp.bfloat16),
                       preferred_element_type=jnp.float32) + bhT_ref[...])

    # Stage 3: fused narrow projections (one MXU push):
    #   row 0    = pred-head pre-sigmoid scalar
    #   row 1    = sigma-head pre-softplus scalar
    #   rows 2.. = regime hidden-2 (pre-ReLU)
    midT = (jnp.dot(wmT_ref[...], hT.astype(jnp.bfloat16),
                    preferred_element_type=jnp.float32) + bmT_ref[...])

    # Sublane-gated ReLU: rows >= 2 get ReLU, rows 0/1 pass through unchanged.
    # Pure VPU (iota + cmp + max + select); no transcendentals in the kernel.
    row = jax.lax.broadcasted_iota(jnp.int32, midT.shape, 0)
    actT = jnp.where(row >= 2, _relu(midT), midT)

    # Stage 4: packed final projection -> lane-dense (8, tb) output slab:
    #   row 0 = p_pre, row 1 = sigma_pre, rows 2..4 = regime logits, rows 5..7 = 0.
    outT_ref[...] = (jnp.dot(wfT_ref[...], actT.astype(jnp.bfloat16),
                             preferred_element_type=jnp.float32) + bfT_ref[...])


def pack_params(p):
    """Pack torch-style (fan_in, fan_out) weights into transposed fused operands."""
    f32, bf16 = jnp.float32, jnp.bfloat16
    h2 = p["wp1"].shape[1]            # 32
    h4 = p["wr2"].shape[1]            # 16
    n_regimes = p["wr3"].shape[1]     # 3

    w1T = p["w1"].T.astype(bf16)                                        # (64, in_dim)
    b1T = p["b1"].reshape(-1, 1).astype(f32)                            # (64, 1)

    whT = jnp.concatenate([p["wp1"], p["ws1"], p["wr1"]], axis=1).T.astype(bf16)   # (96, 64)
    bhT = jnp.concatenate([p["bp1"], p["bs1"], p["br1"]], axis=1).reshape(-1, 1).astype(f32)

    wmT = jnp.zeros((2 + h4, 3 * h2), f32)                              # (18, 96)
    wmT = wmT.at[0:1, 0:h2].set(p["wp2"].T)
    wmT = wmT.at[1:2, h2:2 * h2].set(p["ws2"].T)
    wmT = wmT.at[2:2 + h4, 2 * h2:3 * h2].set(p["wr2"].T)
    wmT = wmT.astype(bf16)
    bmT = jnp.concatenate([p["bp2"], p["bs2"], p["br2"]], axis=1).reshape(-1, 1).astype(f32)

    wfT = jnp.zeros((OUT_ROWS, 2 + h4), f32)                            # (8, 18)
    wfT = wfT.at[0, 0].set(1.0)                                         # p_pre pass-through
    wfT = wfT.at[1, 1].set(1.0)                                         # sigma_pre pass-through
    wfT = wfT.at[2:2 + n_regimes, 2:2 + h4].set(p["wr3"].T)
    wfT = wfT.astype(bf16)
    bfT = jnp.zeros((OUT_ROWS, 1), f32)
    bfT = bfT.at[2:2 + n_regimes, 0].set(p["br3"][0])

    return dict(w1T=w1T, b1T=b1T, whT=whT, bhT=bhT,
                wmT=wmT, bmT=bmT, wfT=wfT, bfT=bfT)


def _choose_tiling(B, tile_b):
    # Lane-dense tiles (multiple of 128), padding kept small (no rounding B up to
    # a full big tile), and >= 2 grid steps when there is enough work so the
    # "parallel" axis spans both v7x TensorCores.
    n_steps = pl.cdiv(B, tile_b)
    if B >= 256:
        n_steps = max(n_steps, 2)
    tb = _round_up(pl.cdiv(B, n_steps), 128)
    return tb, tb * n_steps, n_steps


def prediction_model_forward(x, pk, n_regimes=3, tile_b=TILE_B_DEFAULT):
    """x: (B, in_dim) or (B, S, in_dim) -> (p_t (B,1), sigma_t (B,1), regime (B,n))."""
    if x.ndim == 3:
        x = x[:, -1, :]                        # last timestep (cheap wrapper slice)
    if x.dtype not in (jnp.bfloat16, jnp.float32):
        x = x.astype(jnp.float32)              # accept bf16 as-is; no extra cast added
    B, in_dim = x.shape

    tb, B_pad, n_steps = _choose_tiling(B, tile_b)
    # Batch on the lane axis: transpose (+pad) once on the wrapper side so the
    # kernel needs no in-kernel transposes and input/output tiles are lane-dense.
    xT = x.T
    if B_pad != B:
        xT = jnp.pad(xT, ((0, 0), (0, B_pad - B)))

    const = lambda i: (0, 0)                    # weights resident across grid steps
    in_specs = [
        pl.BlockSpec((in_dim, tb), lambda i: (0, i)),
        pl.BlockSpec(pk["w1T"].shape, const), pl.BlockSpec(pk["b1T"].shape, const),
        pl.BlockSpec(pk["whT"].shape, const), pl.BlockSpec(pk["bhT"].shape, const),
        pl.BlockSpec(pk["wmT"].shape, const), pl.BlockSpec(pk["bmT"].shape, const),
        pl.BlockSpec(pk["wfT"].shape, const), pl.BlockSpec(pk["bfT"].shape, const),
    ]
    out_spec = pl.BlockSpec((OUT_ROWS, tb), lambda i: (0, i))

    w_bytes = sum(int(v.size) * v.dtype.itemsize for v in pk.values())
    flops = 2 * B_pad * sum(int(pk[k].shape[0]) * int(pk[k].shape[1])
                            for k in ("w1T", "whT", "wmT", "wfT"))
    cost = pl.CostEstimate(
        flops=flops, transcendentals=0,
        bytes_accessed=B_pad * (in_dim * x.dtype.itemsize + OUT_ROWS * 4) + w_bytes)

    outT = pl.pallas_call(
        prediction_kernel,
        out_shape=jax.ShapeDtypeStruct((OUT_ROWS, B_pad), jnp.float32),
        grid=(n_steps,),
        in_specs=in_specs,
        out_specs=out_spec,
        compiler_params=pltpu.CompilerParams(
            dimension_semantics=("parallel",),
            vmem_limit_bytes=32 * 1024 * 1024),
        cost_estimate=cost,
    )(xT, pk["w1T"], pk["b1T"], pk["whT"], pk["bhT"],
      pk["wmT"], pk["bmT"], pk["wfT"], pk["bfT"])

    # Tiny (B,)-sized epilogues: exact sigmoid / softplus here instead of burning
    # the single in-kernel EUP slot on lane-padded vregs (rows 0/1 of outT are the
    # pre-activation values, passed through the final packed matmul unchanged).
    p_t = jax.nn.sigmoid(outT[0, :B])[:, None]
    sigma_t = (_softplus(outT[1, :B]) + 0.01)[:, None]
    regime_logits = outT[2:2 + n_regimes, :B].T
    return p_t, sigma_t, regime_logits


def init_params(key, in_dim, hidden_dim=64, n_regimes=3):
    """torch.nn.Linear-style init: U(-1/sqrt(fan_in), 1/sqrt(fan_in))."""
    h2 = hidden_dim // 2            # 32
    h4 = h2 // 2                    # 16 (RegimeClassifier hidden_dim // 2)

    def lin(k, fan_in, fan_out):
        k1, k2 = jax.random.split(k)
        bound = 1.0 / jnp.sqrt(jnp.float32(fan_in))
        w = jax.random.uniform(k1, (fan_in, fan_out), jnp.float32, -bound, bound)
        b = jax.random.uniform(k2, (1, fan_out), jnp.float32, -bound, bound)
        return w, b

    ks = jax.random.split(key, 8)
    w1, b1 = lin(ks[0], in_dim, hidden_dim)      # feature_extractor
    wp1, bp1 = lin(ks[1], hidden_dim, h2)        # pred_head[0]
    wp2, bp2 = lin(ks[2], h2, 1)                 # pred_head[3]
    ws1, bs1 = lin(ks[3], hidden_dim, h2)        # sigma_head[0]
    ws2, bs2 = lin(ks[4], h2, 1)                 # sigma_head[3]
    wr1, br1 = lin(ks[5], hidden_dim, h2)        # regime feature_extractor[0]
    wr2, br2 = lin(ks[6], h2, h4)                # regime feature_extractor[3]
    wr3, br3 = lin(ks[7], h4, n_regimes)         # regime_head
    return dict(w1=w1, b1=b1, wp1=wp1, bp1=bp1, wp2=wp2, bp2=bp2,
                ws1=ws1, bs1=bs1, ws2=ws2, bs2=bs2,
                wr1=wr1, br1=br1, wr2=wr2, br2=br2, wr3=wr3, br3=br3)


def _sigmoid_ref(x):
    return 1.0 / (1.0 + jnp.exp(-x))


def _reference_forward(x, p):
    """Pure-jnp f32 reference (matches the PyTorch forward in eval mode)."""
    if x.ndim == 3:
        x = x[:, -1, :]
    feat = _relu(x @ p["w1"] + p["b1"])
    pt = _sigmoid_ref(_relu(feat @ p["wp1"] + p["bp1"]) @ p["wp2"] + p["bp2"])
    st = _softplus(_relu(feat @ p["ws1"] + p["bs1"]) @ p["ws2"] + p["bs2"]) + 0.01
    hr = _relu(_relu(feat @ p["wr1"] + p["br1"]) @ p["wr2"] + p["br2"])
    rl = hr @ p["wr3"] + p["br3"]
    return pt, st, rl


if __name__ == "__main__":
    key = jax.random.PRNGKey(0)
    k_param, k_x, k_x2 = jax.random.split(key, 3)

    batch, seq, in_dim, hidden_dim, n_regimes = 8, 8, 16, 64, 3
    params = init_params(k_param, in_dim, hidden_dim, n_regimes)
    packed = pack_params(params)

    # --- sequence input path (takes last timestep) ---
    x = jax.random.normal(k_x, (batch, seq, in_dim), jnp.float32)
    p_t, sigma_t, regime_logits = prediction_model_forward(x, packed, n_regimes)
    jax.block_until_ready((p_t, sigma_t, regime_logits))

    rp, rs, rr = _reference_forward(x, params)
    assert p_t.shape == (batch, 1) and sigma_t.shape == (batch, 1)
    assert regime_logits.shape == (batch, n_regimes)
    # bf16 MXU operands -> looser tolerance vs. the f32 reference
    assert jnp.allclose(p_t, rp, atol=3e-2, rtol=3e-2)
    assert jnp.allclose(sigma_t, rs, atol=3e-2, rtol=3e-2)
    assert jnp.allclose(regime_logits, rr, atol=3e-2, rtol=3e-2)

    # --- plain-vector path, batch not a multiple of the tile (exercises padding) ---
    x2 = jax.random.normal(k_x2, (10, in_dim), jnp.float32)
    p2, s2, r2 = prediction_model_forward(x2, packed, n_regimes)
    jax.block_until_ready((p2, s2, r2))
    rp2, rs2, rr2 = _reference_forward(x2, params)
    assert p2.shape == (10, 1) and s2.shape == (10, 1) and r2.shape == (10, n_regimes)
    assert jnp.allclose(p2, rp2, atol=3e-2, rtol=3e-2)
    assert jnp.allclose(s2, rs2, atol=3e-2, rtol=3e-2)
    assert jnp.allclose(r2, rr2, atol=3e-2, rtol=3e-2)

    print("KERNEL_OK")
</pallas_src>

<mosaic_0001>
module attributes {stable_mosaic.version = 11 : i64} {
  func.func @prediction_kernel(%arg0: i32, %arg1: memref<16x128xf32, #tpu.memory_space<vmem>>, %arg2: memref<64x16xbf16, #tpu.memory_space<vmem>>, %arg3: memref<64x1xf32, #tpu.memory_space<vmem>>, %arg4: memref<96x64xbf16, #tpu.memory_space<vmem>>, %arg5: memref<96x1xf32, #tpu.memory_space<vmem>>, %arg6: memref<18x96xbf16, #tpu.memory_space<vmem>>, %arg7: memref<18x1xf32, #tpu.memory_space<vmem>>, %arg8: memref<8x18xbf16, #tpu.memory_space<vmem>>, %arg9: memref<8x1xf32, #tpu.memory_space<vmem>>, %arg10: memref<8x128xf32, #tpu.memory_space<vmem>>) attributes {dimension_semantics = [#tpu.dimension_semantics<parallel>], iteration_bounds = array<i64: 1>, scalar_prefetch = 0 : i64, scratch_operands = 0 : i64, tpu.core_type = #tpu.core_type<tc>, window_params = [{transform_indices = @transform_0, window_bounds = array<i64: 16, 128>}, {pipeline_mode = #tpu.pipeline_mode<synchronous>, transform_indices = @transform_1, window_bounds = array<i64: 64, 16>}, {pipeline_mode = #tpu.pipeline_mode<synchronous>, transform_indices = @transform_2, window_bounds = array<i64: 64, 1>}, {pipeline_mode = #tpu.pipeline_mode<synchronous>, transform_indices = @transform_3, window_bounds = array<i64: 96, 64>}, {pipeline_mode = #tpu.pipeline_mode<synchronous>, transform_indices = @transform_4, window_bounds = array<i64: 96, 1>}, {pipeline_mode = #tpu.pipeline_mode<synchronous>, transform_indices = @transform_5, window_bounds = array<i64: 18, 96>}, {pipeline_mode = #tpu.pipeline_mode<synchronous>, transform_indices = @transform_6, window_bounds = array<i64: 18, 1>}, {pipeline_mode = #tpu.pipeline_mode<synchronous>, transform_indices = @transform_7, window_bounds = array<i64: 8, 18>}, {pipeline_mode = #tpu.pipeline_mode<synchronous>, transform_indices = @transform_8, window_bounds = array<i64: 8, 1>}, {transform_indices = @transform_9, window_bounds = array<i64: 8, 128>}]} {
    %c0 = arith.constant 0 : index
    %c0_0 = arith.constant 0 : index
    %0 = vector.load %arg1[%c0, %c0_0] : memref<16x128xf32, #tpu.memory_space<vmem>>, vector<16x128xf32>
    %1 = arith.truncf %0 : vector<16x128xf32> to vector<16x128xbf16>
    %c0_1 = arith.constant 0 : index
    %c0_2 = arith.constant 0 : index
    %2 = vector.load %arg2[%c0_1, %c0_2] : memref<64x16xbf16, #tpu.memory_space<vmem>>, vector<64x16xbf16>
    %cst = arith.constant dense<0.000000e+00> : vector<64x128xf32>
    %3 = tpu.matmul %2, %1, %cst {dimension_numbers = #tpu.dot_dimension_numbers<[1], [0], [0], [1], [0, 0, 1, 1], [], []>} : vector<64x16xbf16>, vector<16x128xbf16>, vector<64x128xf32> -> vector<64x128xf32>
    %c0_3 = arith.constant 0 : index
    %c0_4 = arith.constant 0 : index
    %4 = vector.load %arg3[%c0_3, %c0_4] : memref<64x1xf32, #tpu.memory_space<vmem>>, vector<64x1xf32>
    %5 = vector.broadcast %4 : vector<64x1xf32> to vector<64x128xf32>
    %6 = arith.addf %3, %5 : vector<64x128xf32>
    %cst_5 = arith.constant 0.000000e+00 : f32
    %7 = vector.broadcast %cst_5 : f32 to vector<64x128xf32>
    %8 = arith.maximumf %6, %7 : vector<64x128xf32>
    %c0_6 = arith.constant 0 : index
    %c0_7 = arith.constant 0 : index
    %9 = vector.load %arg4[%c0_6, %c0_7] : memref<96x64xbf16, #tpu.memory_space<vmem>>, vector<96x64xbf16>
    %10 = arith.truncf %8 : vector<64x128xf32> to vector<64x128xbf16>
    %cst_8 = arith.constant dense<0.000000e+00> : vector<96x128xf32>
    %11 = tpu.matmul %9, %10, %cst_8 {dimension_numbers = #tpu.dot_dimension_numbers<[1], [0], [0], [1], [0, 0, 1, 1], [], []>} : vector<96x64xbf16>, vector<64x128xbf16>, vector<96x128xf32> -> vector<96x128xf32>
    %c0_9 = arith.constant 0 : index
    %c0_10 = arith.constant 0 : index
    %12 = vector.load %arg5[%c0_9, %c0_10] : memref<96x1xf32, #tpu.memory_space<vmem>>, vector<96x1xf32>
    %13 = vector.broadcast %12 : vector<96x1xf32> to vector<96x128xf32>
    %14 = arith.addf %11, %13 : vector<96x128xf32>
    %cst_11 = arith.constant 0.000000e+00 : f32
    %15 = vector.broadcast %cst_11 : f32 to vector<96x128xf32>
    %16 = arith.maximumf %14, %15 : vector<96x128xf32>
    %c0_12 = arith.constant 0 : index
    %c0_13 = arith.constant 0 : index
    %17 = vector.load %arg6[%c0_12, %c0_13] : memref<18x96xbf16, #tpu.memory_space<vmem>>, vector<18x96xbf16>
    %18 = arith.truncf %16 : vector<96x128xf32> to vector<96x128xbf16>
    %cst_14 = arith.constant dense<0.000000e+00> : vector<18x128xf32>
    %19 = tpu.matmul %17, %18, %cst_14 {dimension_numbers = #tpu.dot_dimension_numbers<[1], [0], [0], [1], [0, 0, 1, 1], [], []>} : vector<18x96xbf16>, vector<96x128xbf16>, vector<18x128xf32> -> vector<18x128xf32>
    %c0_15 = arith.constant 0 : index
    %c0_16 = arith.constant 0 : index
    %20 = vector.load %arg7[%c0_15, %c0_16] : memref<18x1xf32, #tpu.memory_space<vmem>>, vector<18x1xf32>
    %21 = vector.broadcast %20 : vector<18x1xf32> to vector<18x128xf32>
    %22 = arith.addf %19, %21 : vector<18x128xf32>
    %23 = tpu.iota {dimensions = array<i32: 0>} : vector<18x128xi32>
    %c2_i32 = arith.constant 2 : i32
    %24 = vector.broadcast %c2_i32 : i32 to vector<18x128xi32>
    %25 = arith.cmpi sge, %23, %24 : vector<18x128xi32>
    %cst_17 = arith.constant 0.000000e+00 : f32
    %26 = vector.broadcast %cst_17 : f32 to vector<18x128xf32>
    %27 = arith.maximumf %22, %26 : vector<18x128xf32>
    %28 = arith.select %25, %27, %22 : vector<18x128xi1>, vector<18x128xf32>
    %c0_18 = arith.constant 0 : index
    %c0_19 = arith.constant 0 : index
    %29 = vector.load %arg8[%c0_18, %c0_19] : memref<8x18xbf16, #tpu.memory_space<vmem>>, vector<8x18xbf16>
    %30 = arith.truncf %28 : vector<18x128xf32> to vector<18x128xbf16>
    %cst_20 = arith.constant dense<0.000000e+00> : vector<8x128xf32>
    %31 = tpu.matmul %29, %30, %cst_20 {dimension_numbers = #tpu.dot_dimension_numbers<[1], [0], [0], [1], [0, 0, 1, 1], [], []>} : vector<8x18xbf16>, vector<18x128xbf16>, vector<8x128xf32> -> vector<8x128xf32>
    %c0_21 = arith.constant 0 : index
    %c0_22 = arith.constant 0 : index
    %32 = vector.load %arg9[%c0_21, %c0_22] : memref<8x1xf32, #tpu.memory_space<vmem>>, vector<8x1xf32>
    %33 = vector.broadcast %32 : vector<8x1xf32> to vector<8x128xf32>
    %34 = arith.addf %31, %33 : vector<8x128xf32>
    %c0_23 = arith.constant 0 : index
    %c0_24 = arith.constant 0 : index
    %35 = vector.load %arg10[%c0_23, %c0_24] : memref<8x128xf32, #tpu.memory_space<vmem>>, vector<8x128xf32>
    tpu.vector_store %arg10[%c0_23, %c0_24], %34 {strides = array<i32>} : memref<8x128xf32, #tpu.memory_space<vmem>>, vector<8x128xf32>,
    return
  }
  func.func @transform_0(%arg0: i32) -> (i32, i32) {
    %c0_i32 = arith.constant 0 : i32
    %c0_i32_0 = arith.constant 0 : i32
    return %c0_i32, %arg0 : i32, i32
  }
  func.func @transform_1(%arg0: i32) -> (i32, i32) {
    %c0_i32 = arith.constant 0 : i32
    %c0_i32_0 = arith.constant 0 : i32
    %c0_i32_1 = arith.constant 0 : i32
    return %c0_i32, %c0_i32_0 : i32, i32
  }
  func.func @transform_2(%arg0: i32) -> (i32, i32) {
    %c0_i32 = arith.constant 0 : i32
    %c0_i32_0 = arith.constant 0 : i32
    %c0_i32_1 = arith.constant 0 : i32
    return %c0_i32, %c0_i32_0 : i32, i32
  }
  func.func @transform_3(%arg0: i32) -> (i32, i32) {
    %c0_i32 = arith.constant 0 : i32
    %c0_i32_0 = arith.constant 0 : i32
    %c0_i32_1 = arith.constant 0 : i32
    return %c0_i32, %c0_i32_0 : i32, i32
  }
  func.func @transform_4(%arg0: i32) -> (i32, i32) {
    %c0_i32 = arith.constant 0 : i32
    %c0_i32_0 = arith.constant 0 : i32
    %c0_i32_1 = arith.constant 0 : i32
    return %c0_i32, %c0_i32_0 : i32, i32
  }
  func.func @transform_5(%arg0: i32) -> (i32, i32) {
    %c0_i32 = arith.constant 0 : i32
    %c0_i32_0 = arith.constant 0 : i32
    %c0_i32_1 = arith.constant 0 : i32
    return %c0_i32, %c0_i32_0 : i32, i32
  }
  func.func @transform_6(%arg0: i32) -> (i32, i32) {
    %c0_i32 = arith.constant 0 : i32
    %c0_i32_0 = arith.constant 0 : i32
    %c0_i32_1 = arith.constant 0 : i32
    return %c0_i32, %c0_i32_0 : i32, i32
  }
  func.func @transform_7(%arg0: i32) -> (i32, i32) {
    %c0_i32 = arith.constant 0 : i32
    %c0_i32_0 = arith.constant 0 : i32
    %c0_i32_1 = arith.constant 0 : i32
    return %c0_i32, %c0_i32_0 : i32, i32
  }
  func.func @transform_8(%arg0: i32) -> (i32, i32) {
    %c0_i32 = arith.constant 0 : i32
    %c0_i32_0 = arith.constant 0 : i32
    %c0_i32_1 = arith.constant 0 : i32
    return %c0_i32, %c0_i32_0 : i32, i32
  }
  func.func @transform_9(%arg0: i32) -> (i32, i32) {
    %c0_i32 = arith.constant 0 : i32
    %c0_i32_0 = arith.constant 0 : i32
    return %c0_i32, %arg0 : i32, i32
  }
}

</mosaic_0001>

<bundles_post_ra>
// kernel: tpu_custom_call.1
= control target key start
LH: loop header
LB: loop body
LE: loop exit
PB: predicated region body
PF: predicated region fallthrough
CT: control target
= control target key end

     0   :  { %vm113_vm0 = vcmask 130048   ;;  %v749_v4 = vmov 0   ;;  %s935_s0 = inlined_call_operand.vmem [shape: f32[16,128], index: 0, kind: input, shape index: {}]   ;;  %s936_s1 = inlined_call_operand.vmem [shape: bf16[64,16], index: 1, kind: input, shape index: {}]   ;;  %s937_s2 = inlined_call_operand.vmem [shape: f32[64,1], index: 2, kind: input, shape index: {}]   ;;  %s938_s3 = inlined_call_operand.vmem [shape: bf16[96,64], index: 3, kind: input, shape index: {}]   ;;  %s939_s4 = inlined_call_operand.vmem [shape: f32[96,1], index: 4, kind: input, shape index: {}]   ;;  %s940_s5 = inlined_call_operand.vmem [shape: bf16[18,96], index: 5, kind: input, shape index: {}]   ;;  %s941_s6 = inlined_call_operand.vmem [shape: f32[18,1], index: 6, kind: input, shape index: {}]   ;;  %s942_s7 = inlined_call_operand.vmem [shape: bf16[8,18], index: 7, kind: input, shape index: {}]   ;;  %s943_s8 = inlined_call_operand.vmem [shape: f32[8,1], index: 8, kind: input, shape index: {}]   ;;  %s944_s9 = inlined_call_operand.hbm [shape: f32[8,128], index: 9, kind: output, shape index: {}]  }
   0x1   :  { %v34_v0 = vld [vmem:[%s935_s0] sm:$0xff]  ;;  %v35_v1 = vld [vmem:[%s935_s0 + $0x8] sm:$0xff]  ;;  %713 = vset.pattern.permute.xlu0 %v749_v4  ;;  %714 = vset.pattern.permute.xlu1 %v749_v4  ;;  %v717_v6 = vld [vmem:[%s936_s1 + $0x10] sm:$0xff]  }
   0x2   :  { %v36_v2 = vpack.c.bf16 %v35_v1, %v34_v0  ;;  %v715_v3 = vld [vmem:[%s936_s1] sm:$0xff]   ;;  %v716_v5 = vld [vmem:[%s936_s1 + $0x8] sm:$0xff]   ;;  %v51_v7 = vld [vmem:[%s937_s2 + $0x30] sm:$0xff] }
   0x3   :  { %657 = vmatprep.mubr.msk.bf16.mxu0 %vm113_vm0, %v715_v3  ;;  %85 = vperm.xlu0 %713, %v51_v7   ;;  %v49_v8 = vld [vmem:[%s937_s2 + $0x20] sm:$0xff]  ;;  %v52_v9 = vld [vmem:[%s937_s2 + $0x38] sm:$0xff]  ;;  %v50_v10 = vld [vmem:[%s937_s2 + $0x28] sm:$0xff] }
   0x4   :  { %655 = vmatprep.subr.bf16.mxu0 %v36_v2  ;;  %75 = vperm.xlu1 %714, %v49_v8   ;;  %v47_v11 = vld [vmem:[%s937_s2 + $0x10] sm:$0xff]  ;;  %v718_v12 = vld [vmem:[%s936_s1 + $0x18] sm:$0xff]   ;;  %v45_v14 = vld [vmem:[%s937_s2] sm:$0xff] }
   0x5   :  { %656 = vmatpush3.bf16.msra.mxu0 %v36_v2  ;;  %v48_v13 = vld [vmem:[%s937_s2 + $0x18] sm:$0xff]  ;;  %v46_v15 = vld [vmem:[%s937_s2 + $0x8] sm:$0xff] }
   0x7   :  { %90 = vperm.xlu0 %713, %v52_v9  }
   0x8   :  { %658 = vmatmul.mubr.msk.bf16.vlgmr.msra.gmra.mxu0 %vm113_vm0, %v716_v5  ;;  %80 = vperm.xlu1 %714, %v50_v10  }
   0x9   :  { %661 = vmatprep.mubr.msk.bf16.mxu0 %vm113_vm0, %v717_v6 }
   0xb   :  { %65 = vperm.xlu0 %713, %v47_v11  }
   0xc   :  { %70 = vperm.xlu1 %714, %v48_v13  }
   0xf   :  { %55 = vperm.xlu0 %713, %v45_v14  }
  0x10   :  { %662 = vmatmul.mubr.msk.bf16.gmra.mxu0 %vm113_vm0, %v718_v12 }
  0x11   :  { %14 = vsyncpa [#allocation3], 0  ;;  %60 = vperm.xlu1 %714, %v46_v15   ;;  %v225_v16 = vld [vmem:[%s939_s4 + $0x50] sm:$0xff]  ;;  %v226_v17 = vld [vmem:[%s939_s4 + $0x58] sm:$0xff]  ;;  %vm317_vm1 = vcmask 523264   ;;  %vm464_vm2 = vcmask 785408  }
  0x12   :  { %v223_v18 = vld [vmem:[%s939_s4 + $0x40] sm:$0xff]  ;;  %v224_v19 = vld [vmem:[%s939_s4 + $0x48] sm:$0xff]  ;;  %v221_v20 = vld [vmem:[%s939_s4 + $0x30] sm:$0xff]  ;;  %vm751_vm3 = vmmov 0   ;;  %vm545_vm4 = vcmask 1040384   ;;  %vm541_vm6 = vcmask 146432  }
  0x13   :  { %279 = vperm.xlu0 %713, %v225_v16   ;;  %v222_v21 = vld [vmem:[%s939_s4 + $0x38] sm:$0xff]  ;;  %v219_v22 = vld [vmem:[%s939_s4 + $0x20] sm:$0xff]  ;;  %v220_v23 = vld [vmem:[%s939_s4 + $0x28] sm:$0xff]  ;;  %s752_s12 = smov [#allocation2]  }
  0x14   :  { %v217_v24 = vld [vmem:[%s939_s4 + $0x10] sm:$0xff]  ;;  %v218_v25 = vld [vmem:[%s939_s4 + $0x18] sm:$0xff]  ;;  %v215_v26 = vld [vmem:[%s939_s4] sm:$0xff]  ;;  %s596_s13 = sshll.u32 %s752_s12, 4  ;;  %s597_s13 = int_to_ptr.vmem [resolvable:$true] %s596_s13 }
  0x15   :  { %284 = vperm.xlu1 %714, %v226_v17   ;;  %v216_v27 = vld [vmem:[%s939_s4 + $0x8] sm:$0xff]  ;;  %v440_v28 = vld [vmem:[%s941_s6 + $0x10] sm:$0x3]  ;;  %v438_v29 = vld [vmem:[%s941_s6] sm:$0xff]  ;;  %s727_s14 = scalar_lea.vmem %s597_s13, 128  ;;  %p732_p1 = scmp.lt.s32.totalorder %s597_s13, %s597_s13 }
  0x16   :  { %v439_v30 = vld [vmem:[%s941_s6 + $0x8] sm:$0xff]  ;;  %v535_v31 = vld [vmem:[%s943_s8] sm:$0xff]  ;;  %v721_v6 = vld [vmem:[%s938_s3 + $0x10] sm:$0xff]   ;;  %p728_p0 = scmp.ne.s32.totalorder %s597_s13, %s727_s14  ;;  %p733_p2 = scmp.lt.s32.totalorder %s727_s14, %s727_s14 }
  0x17   :  { %269 = vperm.xlu0 %713, %v223_v18   ;;  %v719_v32 = vld [vmem:[%s938_s3] sm:$0xff]   ;;  %v720_v5 = vld [vmem:[%s938_s3 + $0x8] sm:$0xff]   ;;  %v722_v7 = vld [vmem:[%s938_s3 + $0x18] sm:$0xff]  }
  0x18   :  { %673 = vmatprep.mubr.msk.bf16.mxu1 %vm317_vm1, %v719_v32  ;;  %v723_v8 = vld [vmem:[%s938_s3 + $0x20] sm:$0xff]   ;;  %v724_v9 = vld [vmem:[%s938_s3 + $0x28] sm:$0xff]   ;;  %p734_p3 = por %p733_p2, %p732_p1 }
  0x19   :  { %274 = vperm.xlu1 %714, %v224_v19   ;;  %v725_v10 = vld [vmem:[%s940_s5] sm:$0xff]  }
  0x1a   :  { %697 = vmatprep.mubr.msk.bf16.mxu0 %vm464_vm2, %v725_v10  ;;  %p735_p4 = pnand %p734_p3, %p728_p0 }
  0x1b   :  { %259 = vperm.xlu0 %713, %v221_v20  }
  0x1d   :  { %264 = vperm.xlu1 %714, %v222_v21  }
  0x1f   :  { %249 = vperm.xlu0 %713, %v219_v22  }
  0x21   :  { %254 = vperm.xlu1 %714, %v220_v23  }
  0x23   :  { %239 = vperm.xlu0 %713, %v217_v24  }
  0x25   :  { %244 = vperm.xlu1 %714, %v218_v25  }
  0x27   :  { %229 = vperm.xlu0 %713, %v215_v26  }
  0x29   :  { %234 = vperm.xlu1 %714, %v216_v27  }
  0x2b   :  { %453 = vperm.xlu0 %713, %v440_v28  }
  0x2d   :  { %443 = vperm.xlu1 %714, %v438_v29  }
  0x2f   :  { %448 = vperm.xlu0 %713, %v439_v30  }
  0x31   :  { %538 = vperm.xlu1 %714, %v535_v31  }
  0x7e   :  { %v86_v35 = vpop.permute.xlu0 %85 }
  0x7f   :  { %v76_v33 = vpop.permute.xlu1 %75 }
  0x82   :  { %v91_v40 = vpop.permute.xlu0 %90 }
  0x83   :  { %v81_v38 = vpop.permute.xlu1 %80 }
  0x86   :  { %v66_v48 = vpop.permute.xlu0 %65 }
  0x87   :  { %v71_v44 = vpop.permute.xlu1 %70 }
  0x8a   :  { %v56_v62 = vpop.permute.xlu0 %55 }
  0x8c   :  { %v61_v58 = vpop.permute.xlu1 %60 }
  0x8e   :  { %v280_v15 = vpop.permute.xlu0 %279 }
  0x90   :  { %v285_v13 = vpop.permute.xlu1 %284 }
  0x92   :  { %v270_v20 = vpop.permute.xlu0 %269 }
  0x94   :  { %v275_v18 = vpop.permute.xlu1 %274 }
  0x96   :  { %v260_v25 = vpop.permute.xlu0 %259 }
  0x98   :  { %v265_v23 = vpop.permute.xlu1 %264 }
  0x9c   :  { %v255_v31 = vpop.permute.xlu1 %254 }
  0xc8   :  { %v659_v34 = vpop.f32.mrf.mxu0 }
  0xc9   :  { %v169_v54 = vadd.f32 %v659_v34, %v66_v48 }
  0xca   :  { %v160_v36 = vpop.f32.mrf.mxu0 }
  0xcb   :  { %v193_v63 = vmax.f32 %v169_v54, 0.0  ;;  %v161_v0 = vadd.f32 %v160_v36, %v56_v62 }
  0xcc   :  { %v660_v37 = vpop.f32.mrf.mxu0 }
  0xcd   :  { %v172_v50 = vadd.f32 %v660_v37, %v71_v44  ;;  %v191_v3 = vmax.f32 %v161_v0, 0.0  ;;  %v250_v37 = vpop.permute.xlu0 %249 }
  0xce   :  { %v163_v39 = vpop.f32.mrf.mxu0 }
  0xcf   :  { %v194_v59 = vmax.f32 %v172_v50, 0.0  ;;  %v164_v60 = vadd.f32 %v163_v39, %v61_v58 }
  0xd0   :  { %v663_v41 = vpop.f32.mrf.mxu0 }
  0xd1   :  { %v185_v43 = vadd.f32 %v663_v41, %v86_v35  ;;  %v212_v1 = vpack.c.bf16 %v194_v59, %v193_v63  ;;  %v192_v2 = vmax.f32 %v164_v60, 0.0  ;;  %v240_v48 = vpop.permute.xlu0 %239 }
  0xd2   :  { %v176_v42 = vpop.f32.mrf.mxu0 }
  0xd3   :  { %v177_v46 = vadd.f32 %v176_v42, %v76_v33  ;;  %v197_v51 = vmax.f32 %v185_v43, 0.0  ;;  %v211_v4 = vpack.c.bf16 %v192_v2, %v191_v3  ;;  %v750_v2 = vmov 0.0  }
  0xd4   :  { %v664_v45 = vpop.f32.mrf.mxu0  ;;  %v519_v3 = vlaneseq }
  0xd5   :  { %v188_v47 = vadd.f32 %v664_v45, %v91_v40  ;;  %v195_v55 = vmax.f32 %v177_v46, 0.0  ;;  %v245_v45 = vpop.permute.xlu1 %244  ;;  %v230_v58 = vpop.permute.xlu0 %229 }
  0xd6   :  { %v179_v49 = vpop.f32.mrf.mxu0 }
  0xd7   :  { %v198_v52 = vmax.f32 %v188_v47, 0.0  ;;  %v180_v53 = vadd.f32 %v179_v49, %v81_v38 }
  0xd9   :  { %v196_v56 = vmax.f32 %v180_v53, 0.0  ;;  %v214_v57 = vpack.c.bf16 %v198_v52, %v197_v51  ;;  %v235_v54 = vpop.permute.xlu1 %234 }
  0xdb   :  { %v213_v61 = vpack.c.bf16 %v196_v56, %v195_v55  ;;  %665 = vmatprep.subr.bf16.mxu1 %v214_v57 }
  0xdc   :  { %666 = vmatpush3.bf16.msra.mxu1 %v214_v57 }
  0xdd   :  { %667 = vmatprep.subr.bf16.mxu1 %v213_v61 }
  0xe0   :  { %668 = vmatpush3.bf16.msra.mxu1 %v213_v61 }
  0xe1   :  { %669 = vmatprep.subr.bf16.mxu1 %v212_v1 }
  0xe4   :  { %670 = vmatpush3.bf16.msra.mxu1 %v212_v1  ;;  %v726_v1 = vld [vmem:[%s940_s5 + $0x8] ss:$0 sps:$4 sm:$0x11]  }
  0xe5   :  { %671 = vmatprep.subr.bf16.mxu1 %v211_v4 }
  0xe8   :  { %672 = vmatpush3.bf16.msra.mxu1 %v211_v4  ;;  %v454_v4 = vpop.permute.xlu0 %453 }
  0xeb   :  { %674 = vmatmul.mubr.msk.bf16.vlgmr.msra.gmra.mxu1 %vm317_vm1, %v720_v5 }
  0xec   :  { %677 = vmatprep.mubr.msk.bf16.mxu1 %vm317_vm1, %v721_v6 }
  0xf3   :  { %678 = vmatmul.mubr.msk.bf16.gmra.mxu1 %vm317_vm1, %v722_v7  ;;  %v444_v7 = vpop.permute.xlu1 %443 }
  0xf4   :  { %681 = vmatprep.mubr.msk.bf16.mxu1 %vm317_vm1, %v723_v8 }
  0xfb   :  { %682 = vmatmul.mubr.msk.bf16.gmra.mxu1 %vm317_vm1, %v724_v9 }
 0x1ab   :  { %v675_v11 = vpop.f32.mrf.mxu1 }
 0x1ac   :  { %v379_v52 = vadd.f32 %v675_v11, %v240_v48  ;;  %v520_v11 = vshrl.u32 %v519_v3, 7 }
 0x1ad   :  { %v370_v12 = vpop.f32.mrf.mxu1 }
 0x1ae   :  { %v419_v59 = vmax.f32 %v379_v52, 0.0  ;;  %v371_v60 = vadd.f32 %v370_v12, %v230_v58  ;;  %vm523_vm5 = vcmp.ge.s32.totalorder %v520_v11, 2 }
 0x1af   :  { %v676_v14 = vpop.f32.mrf.mxu1 }
 0x1b0   :  { %v382_v49 = vadd.f32 %v676_v14, %v245_v45  ;;  %v417_v63 = vmax.f32 %v371_v60, 0.0  ;;  %v449_v14 = vpop.permute.xlu0 %448 }
 0x1b1   :  { %v373_v16 = vpop.f32.mrf.mxu1 }
 0x1b2   :  { %v420_v55 = vmax.f32 %v382_v49, 0.0  ;;  %v374_v56 = vadd.f32 %v373_v16, %v235_v54 }
 0x1b3   :  { %v679_v17 = vpop.f32.mrf.mxu1 }
 0x1b4   :  { %v395_v38 = vadd.f32 %v679_v17, %v260_v25  ;;  %v433_v61 = vpack.c.bf16 %v420_v55, %v419_v59  ;;  %v418_v62 = vmax.f32 %v374_v56, 0.0 }
 0x1b5   :  { %v386_v19 = vpop.f32.mrf.mxu1 }
 0x1b6   :  { %v423_v46 = vmax.f32 %v395_v38, 0.0  ;;  %v387_v47 = vadd.f32 %v386_v19, %v250_v37  ;;  %v432_v0 = vpack.c.bf16 %v418_v62, %v417_v63 }
 0x1b7   :  { %v680_v21 = vpop.f32.mrf.mxu1 }
 0x1b8   :  { %v398_v33 = vadd.f32 %v680_v21, %v265_v23  ;;  %v421_v53 = vmax.f32 %v387_v47, 0.0  ;;  %v539_v23 = vpop.permute.xlu1 %538 }
 0x1b9   :  { %v389_v22 = vpop.f32.mrf.mxu1 }
 0x1ba   :  { %v424_v42 = vmax.f32 %v398_v33, 0.0  ;;  %v390_v43 = vadd.f32 %v389_v22, %v255_v31  ;;  %v532_v22 = vld [vmem:[%s942_s7] sm:$0xf] }
 0x1bb   :  { %v683_v24 = vpop.f32.mrf.mxu1 }
 0x1bc   :  { %v411_v27 = vadd.f32 %v683_v24, %v280_v15  ;;  %v435_v50 = vpack.c.bf16 %v424_v42, %v423_v46  ;;  %v422_v51 = vmax.f32 %v390_v43, 0.0 }
 0x1bd   :  { %v402_v26 = vpop.f32.mrf.mxu1 }
 0x1be   :  { %v403_v29 = vadd.f32 %v402_v26, %v270_v20  ;;  %v427_v34 = vmax.f32 %v411_v27, 0.0  ;;  %v434_v57 = vpack.c.bf16 %v422_v51, %v421_v53 }
 0x1bf   :  { %v684_v28 = vpop.f32.mrf.mxu1 }
 0x1c0   :  { %v414_v30 = vadd.f32 %v684_v28, %v285_v13  ;;  %v425_v39 = vmax.f32 %v403_v29, 0.0 }
 0x1c1   :  { %v405_v32 = vpop.f32.mrf.mxu1 }
 0x1c2   :  { %v428_v35 = vmax.f32 %v414_v30, 0.0  ;;  %v406_v36 = vadd.f32 %v405_v32, %v275_v18 }
 0x1c4   :  { %v437_v40 = vpack.c.bf16 %v428_v35, %v427_v34  ;;  %v426_v41 = vmax.f32 %v406_v36, 0.0 }
 0x1c6   :  { %v436_v44 = vpack.c.bf16 %v426_v41, %v425_v39  ;;  %685 = vmatprep.subr.bf16.mxu0 %v437_v40 }
 0x1c7   :  { %686 = vmatpush3.bf16.msra.mxu0 %v437_v40 }
 0x1c8   :  { %687 = vmatprep.subr.bf16.mxu0 %v436_v44 }
 0x1cb   :  { %688 = vmatpush3.bf16.msra.mxu0 %v436_v44 }
 0x1cc   :  { %689 = vmatprep.subr.bf16.mxu0 %v435_v50 }
 0x1cf   :  { %690 = vmatpush3.bf16.msra.mxu0 %v435_v50 }
 0x1d0   :  { %691 = vmatprep.subr.bf16.mxu0 %v434_v57 }
 0x1d3   :  { %692 = vmatpush3.bf16.msra.mxu0 %v434_v57 }
 0x1d4   :  { %693 = vmatprep.subr.bf16.mxu0 %v433_v61 }
 0x1d7   :  { %694 = vmatpush3.bf16.msra.mxu0 %v433_v61 }
 0x1d8   :  { %695 = vmatprep.subr.bf16.mxu0 %v432_v0 }
 0x1db   :  { %696 = vmatpush3.bf16.msra.mxu0 %v432_v0 }
 0x1dc   :  { %701 = vmatprep.subr.bf16.mxu0 %v750_v2 }
 0x1de   :  { %698 = vmatmul.mubr.msk.bf16.vlgmr.msra.gmra.mxu0 %vm464_vm2, %v726_v1 }
 0x1df   :  { %705 = vmatprep.mubr.msk.bf16.mxu0 %vm751_vm3, %v750_v2 }
 0x29e   :  { %v699_v5 = vpop.f32.mrf.mxu0 }
 0x29f   :  { %v514_v6 = vadd.f32 %v699_v5, %v454_v4 }
 0x2a0   :  { %v505_v8 = vpop.f32.mrf.mxu0 }
 0x2a1   :  { %v528_v9 = vmax.f32 %v514_v6, 0.0  ;;  %v506_v10 = vadd.f32 %v505_v8, %v444_v7 }
 0x2a2   :  { %v700_v12 = vpop.f32.mrf.mxu0 }
 0x2a3   :  { %v534_v13 = vpack.c.bf16 %v528_v9, %v528_v9  ;;  %v526_v15 = vmax.f32 %v506_v10, 0.0 }
 0x2a4   :  { %v508_v16 = vpop.f32.mrf.mxu0 }
 0x2a5   :  { %v509_v17 = vadd.f32 %v508_v16, %v449_v14  ;;  %v547_v18 = vsel %vm545_vm4, %v534_v13, 0  ;;  %v529_v20 = vsel %vm523_vm5, %v526_v15, %v506_v10 }
 0x2a6   :  { %702 = vmatpush3.bf16.msra.mxu0 %v547_v18 }
 0x2a7   :  { %v527_v19 = vmax.f32 %v509_v17, 0.0  ;;  %703 = vmatprep.subr.bf16.mxu0 %v750_v2 }
 0x2a9   :  { %v533_v21 = vpack.c.bf16 %v527_v19, %v529_v20 }
 0x2ab   :  { %704 = vmatpush3.bf16.msra.mxu0 %v533_v21 }
 0x2ae   :  { %706 = vmatmul.mubr.msk.bf16.vlgmr.msra.gmra.mxu0 %vm541_vm6, %v532_v22 }
 0x36e   :  { %v583_v24 = vpop.f32.mrf.mxu0 }
 0x36f   :  { %v584_v25 = vadd.f32 %v583_v24, %v539_v23 }
 0x370   :  { %v707_v26 = vpop.f32.mrf.mxu0 }
 0x371   :  { %589 = vst [vmem:[#allocation2] sm:$0xff] %v584_v25 }
 0x372   :  { %v586_v27 = vpop.f32.mrf.mxu0 }
 0x373   :  { %738 = shalt.err (!%p735_p4)
}
 0x374   :  { %599 = dma.vmem_to_hbm [thread:$0]  %s597_s13, 128, %s944_s9, [#allocation3]   ;;  %v708_v28 = vpop.f32.mrf.mxu0 }
 0x375   :  { %747 = dma.done.wait [#allocation3], 128  }
 0x376   :  { %748 = vsyncadd [#allocation3], 4294967168 }
 0x377   :  { %603 = vsyncpa [#allocation3], 1 }

</bundles_post_ra>
